<compile_context>
chip_gen: v7x
topology: tpu7x:2x2x1
jax: 0.10.0
libtpu: 0.0.40
codegen_flags: <defaults>
</compile_context>

<pallas_src>
import numpy as np

import jax
import jax.numpy as jnp
from jax import lax
from jax.experimental import pallas as pl
from jax.experimental.pallas import tpu as pltpu


# ------------------------------ host helpers ------------------------------- #

def _make_tap_mask(H, W):
    """(9, H*W) f32 mask: 1.0 where the 3x3 tap (kh,kw) reads a valid pixel
    for output position m = i*W + j (i.e. zero-padding positions are 0)."""
    i = np.arange(H).reshape(H, 1)
    j = np.arange(W).reshape(1, W)
    rows = []
    for kh in range(3):
        for kw in range(3):
            valid = ((i + kh - 1 >= 0) & (i + kh - 1 < H) &
                     (j + kw - 1 >= 0) & (j + kw - 1 < W))
            rows.append(valid.reshape(-1))
    return jnp.asarray(np.stack(rows), dtype=jnp.float32)


# ------------------------------ fused kernel ------------------------------- #

def _make_fused_kernel(H, W, c_in, c1, c2):
    hw = H * W
    # Flat-index offset of tap (kh, kw): reading pixel (i+kh-1, j+kw-1).
    offs = [(kh - 1) * W + (kw - 1) for kh in range(3) for kw in range(3)]

    def kernel(x_ref, w1_ref, b1_ref, w2_ref, b2_ref, mask_ref, o_ref,
               p1_scr, p2_scr):
        x = x_ref[0]                    # (c_in, H*W) f32, H*W on the lane axis
        mask = mask_ref[...]            # (9, H*W)

        def im2col(scr, src, cin):
            # Build the (9*cin, H*W) patches matrix for a 3x3/stride-1/pad-1
            # conv.  Zero padding comes from (a) pre-zeroing the scratch and
            # (b) the per-tap mask (kills the row-wrap positions).
            scr[...] = jnp.zeros_like(scr)
            for t, d in enumerate(offs):
                lo = max(0, -d)              # destination columns [lo, hi)
                hi = min(hw, hw - d)         # stay inside the flat image
                scr[t * cin:(t + 1) * cin, lo:hi] = (
                    src[:, lo + d:hi + d] * mask[t:t + 1, lo:hi])

        # conv1 + bias + relu: single MXU contraction, K = 9*c_in, N = H*W.
        im2col(p1_scr, x, c_in)
        y1 = jnp.maximum(
            jnp.dot(w1_ref[...], p1_scr[...],
                    preferred_element_type=jnp.float32) + b1_ref[...], 0.0)

        # conv2 + bias + relu (input y1 stays in VMEM/vregs).
        im2col(p2_scr, y1, c1)
        y2 = jnp.maximum(
            jnp.dot(w2_ref[...], p2_scr[...],
                    preferred_element_type=jnp.float32) + b2_ref[...], 0.0)

        # Global average pool fused into the epilogue (lane-axis reduction).
        pooled = jnp.sum(y2, axis=1, keepdims=True) * (1.0 / hw)     # (c2, 1)
        o_ref[...] = pooled.reshape(1, c2, 1).astype(o_ref.dtype)

    return kernel


# -------------------------------- wrapper ----------------------------------- #

def feature_extractor_forward(x_nchw, params):
    """Equivalent of FeatureExtractor(submodule, extracted_layers)(x).

    x_nchw: (N, C, H, W) float32 (like the PyTorch module);
    returns (N, C_out, 1, 1)."""
    N, c_in, H, W = x_nchw.shape
    c1 = params["w1"].shape[0]
    c2 = params["w2"].shape[0]
    hw = H * W

    # Layout-preserving (free) reshape: NCHW stays channel-major, spatial is
    # flattened so H*W sits on the 128-lane axis.  No transpose, no pad.
    x_flat = x_nchw.reshape(N, c_in, hw).astype(jnp.float32)

    # One-time tiny weight repack: OIHW -> (Cout, 9*Cin), tap-major /
    # channel-minor to match the im2col row order.
    w1m = jnp.transpose(params["w1"], (0, 2, 3, 1)).reshape(c1, 9 * c_in)
    w2m = jnp.transpose(params["w2"], (0, 2, 3, 1)).reshape(c2, 9 * c1)
    w1m = w1m.astype(jnp.float32)
    w2m = w2m.astype(jnp.float32)
    b1c = params["b1"].reshape(c1, 1).astype(jnp.float32)
    b2c = params["b2"].reshape(c2, 1).astype(jnp.float32)
    mask = _make_tap_mask(H, W)

    kernel = _make_fused_kernel(H, W, c_in, c1, c2)

    out = pl.pallas_call(
        kernel,
        out_shape=jax.ShapeDtypeStruct((N, c2, 1), jnp.float32),
        grid=(N,),
        in_specs=[
            pl.BlockSpec((1, c_in, hw), lambda n: (n, 0, 0)),   # activations
            pl.BlockSpec((c1, 9 * c_in), lambda n: (0, 0)),     # conv1 weights
            pl.BlockSpec((c1, 1), lambda n: (0, 0)),            # conv1 bias
            pl.BlockSpec((c2, 9 * c1), lambda n: (0, 0)),       # conv2 weights
            pl.BlockSpec((c2, 1), lambda n: (0, 0)),            # conv2 bias
            pl.BlockSpec((9, hw), lambda n: (0, 0)),            # tap masks
        ],
        out_specs=pl.BlockSpec((1, c2, 1), lambda n: (n, 0, 0)),
        scratch_shapes=[
            pltpu.VMEM((9 * c_in, hw), jnp.float32),   # conv1 im2col patches
            pltpu.VMEM((9 * c1, hw), jnp.float32),     # conv2 im2col patches
        ],
        compiler_params=pltpu.CompilerParams(
            dimension_semantics=("parallel",)),        # batch across TCs (v7x)
    )(x_flat, w1m, b1c, w2m, b2c, mask)

    return out.reshape(N, c2, 1, 1)


# --------------------------- pure-JAX reference ------------------------------ #

def _ref_forward(x_nchw, params):
    def conv_relu(x, w, b):
        y = lax.conv_general_dilated(
            x, w, window_strides=(1, 1), padding="SAME",
            dimension_numbers=("NCHW", "OIHW", "NCHW"))
        return jnp.maximum(y + b.reshape(1, -1, 1, 1), 0.0)

    x = x_nchw.astype(jnp.float32)
    x = conv_relu(x, params["w1"], params["b1"])
    x = conv_relu(x, params["w2"], params["b2"])
    return jnp.mean(x, axis=(2, 3), keepdims=True)


# ---------------------------------- main ------------------------------------- #

if __name__ == "__main__":
    key = jax.random.PRNGKey(0)
    k_x, k_w1, k_b1, k_w2, k_b2 = jax.random.split(key, 5)

    N, Cin, H, W = 2, 4, 16, 16
    C1, C2 = 8, 16

    x = jax.random.normal(k_x, (N, Cin, H, W), dtype=jnp.float32)
    params = {
        # OIHW weights, exactly like PyTorch Conv2d.
        "w1": jax.random.normal(k_w1, (C1, Cin, 3, 3), jnp.float32) * 0.1,
        "b1": jax.random.normal(k_b1, (C1,), jnp.float32) * 0.1,
        "w2": jax.random.normal(k_w2, (C2, C1, 3, 3), jnp.float32) * 0.1,
        "b2": jax.random.normal(k_b2, (C2,), jnp.float32) * 0.1,
    }

    fwd = jax.jit(feature_extractor_forward)
    out = jax.block_until_ready(fwd(x, params))

    ref = _ref_forward(x, params)
    assert out.shape == (N, C2, 1, 1), out.shape
    assert jnp.allclose(out, ref, rtol=1e-4, atol=1e-5), "mismatch vs reference"

    print("KERNEL_OK")
</pallas_src>

<mosaic_0001>
module attributes {stable_mosaic.version = 11 : i64} {
  func.func @kernel(%arg0: i32, %arg1: memref<1x4x256xf32, #tpu.memory_space<vmem>>, %arg2: memref<8x36xf32, #tpu.memory_space<vmem>>, %arg3: memref<8x1xf32, #tpu.memory_space<vmem>>, %arg4: memref<16x72xf32, #tpu.memory_space<vmem>>, %arg5: memref<16x1xf32, #tpu.memory_space<vmem>>, %arg6: memref<9x256xf32, #tpu.memory_space<vmem>>, %arg7: memref<1x16x1xf32, #tpu.memory_space<vmem>>, %arg8: memref<36x256xf32, #tpu.memory_space<vmem>>, %arg9: memref<72x256xf32, #tpu.memory_space<vmem>>) attributes {dimension_semantics = [#tpu.dimension_semantics<parallel>], iteration_bounds = array<i64: 2>, scalar_prefetch = 0 : i64, scratch_operands = 2 : i64, tpu.core_type = #tpu.core_type<tc>, window_params = [{transform_indices = @transform_0, window_bounds = array<i64: 1, 4, 256>}, {pipeline_mode = #tpu.pipeline_mode<synchronous>, transform_indices = @transform_1, window_bounds = array<i64: 8, 36>}, {pipeline_mode = #tpu.pipeline_mode<synchronous>, transform_indices = @transform_2, window_bounds = array<i64: 8, 1>}, {pipeline_mode = #tpu.pipeline_mode<synchronous>, transform_indices = @transform_3, window_bounds = array<i64: 16, 72>}, {pipeline_mode = #tpu.pipeline_mode<synchronous>, transform_indices = @transform_4, window_bounds = array<i64: 16, 1>}, {pipeline_mode = #tpu.pipeline_mode<synchronous>, transform_indices = @transform_5, window_bounds = array<i64: 9, 256>}, {transform_indices = @transform_6, window_bounds = array<i64: 1, 16, 1>}]} {
    %c0 = arith.constant 0 : index
    %c0_0 = arith.constant 0 : index
    %c0_1 = arith.constant 0 : index
    %0 = vector.load %arg1[%c0, %c0_0, %c0_1] : memref<1x4x256xf32, #tpu.memory_space<vmem>>, vector<1x4x256xf32>
    %1 = vector.shape_cast %0 : vector<1x4x256xf32> to vector<4x256xf32>
    %c0_2 = arith.constant 0 : index
    %c0_3 = arith.constant 0 : index
    %2 = vector.load %arg6[%c0_2, %c0_3] : memref<9x256xf32, #tpu.memory_space<vmem>>, vector<9x256xf32>
    %cst = arith.constant 0.000000e+00 : f32
    %3 = vector.broadcast %cst : f32 to vector<36x256xf32>
    %c0_4 = arith.constant 0 : index
    %c0_5 = arith.constant 0 : index
    %4 = vector.load %arg8[%c0_4, %c0_5] : memref<36x256xf32, #tpu.memory_space<vmem>>, vector<36x256xf32>
    tpu.vector_store %arg8[%c0_4, %c0_5], %3 {strides = array<i32>} : memref<36x256xf32, #tpu.memory_space<vmem>>, vector<36x256xf32>,
    %5 = vector.extract_strided_slice %1 {offsets = [0, 0], sizes = [4, 239], strides = [1, 1]} : vector<4x256xf32> to vector<4x239xf32>
    %6 = vector.extract_strided_slice %2 {offsets = [0, 17], sizes = [1, 239], strides = [1, 1]} : vector<9x256xf32> to vector<1x239xf32>
    %7 = vector.broadcast %6 : vector<1x239xf32> to vector<4x239xf32>
    %8 = arith.mulf %5, %7 : vector<4x239xf32>
    %c0_6 = arith.constant 0 : index
    %c17 = arith.constant 17 : index
    %9 = vector.load %arg8[%c0_6, %c17] : memref<36x256xf32, #tpu.memory_space<vmem>>, vector<4x239xf32>
    tpu.vector_store %arg8[%c0_6, %c17], %8 {strides = array<i32>} : memref<36x256xf32, #tpu.memory_space<vmem>>, vector<4x239xf32>,
    %10 = vector.extract_strided_slice %1 {offsets = [0, 0], sizes = [4, 240], strides = [1, 1]} : vector<4x256xf32> to vector<4x240xf32>
    %11 = vector.extract_strided_slice %2 {offsets = [1, 16], sizes = [1, 240], strides = [1, 1]} : vector<9x256xf32> to vector<1x240xf32>
    %12 = vector.broadcast %11 : vector<1x240xf32> to vector<4x240xf32>
    %13 = arith.mulf %10, %12 : vector<4x240xf32>
    %c4 = arith.constant 4 : index
    %c16 = arith.constant 16 : index
    %14 = vector.load %arg8[%c4, %c16] : memref<36x256xf32, #tpu.memory_space<vmem>>, vector<4x240xf32>
    tpu.vector_store %arg8[%c4, %c16], %13 {strides = array<i32>} : memref<36x256xf32, #tpu.memory_space<vmem>>, vector<4x240xf32>,
    %15 = vector.extract_strided_slice %1 {offsets = [0, 0], sizes = [4, 241], strides = [1, 1]} : vector<4x256xf32> to vector<4x241xf32>
    %16 = vector.extract_strided_slice %2 {offsets = [2, 15], sizes = [1, 241], strides = [1, 1]} : vector<9x256xf32> to vector<1x241xf32>
    %17 = vector.broadcast %16 : vector<1x241xf32> to vector<4x241xf32>
    %18 = arith.mulf %15, %17 : vector<4x241xf32>
    %c8 = arith.constant 8 : index
    %c15 = arith.constant 15 : index
    %19 = vector.load %arg8[%c8, %c15] : memref<36x256xf32, #tpu.memory_space<vmem>>, vector<4x241xf32>
    tpu.vector_store %arg8[%c8, %c15], %18 {strides = array<i32>} : memref<36x256xf32, #tpu.memory_space<vmem>>, vector<4x241xf32>,
    %20 = vector.extract_strided_slice %1 {offsets = [0, 0], sizes = [4, 255], strides = [1, 1]} : vector<4x256xf32> to vector<4x255xf32>
    %21 = vector.extract_strided_slice %2 {offsets = [3, 1], sizes = [1, 255], strides = [1, 1]} : vector<9x256xf32> to vector<1x255xf32>
    %22 = vector.broadcast %21 : vector<1x255xf32> to vector<4x255xf32>
    %23 = arith.mulf %20, %22 : vector<4x255xf32>
    %c12 = arith.constant 12 : index
    %c1 = arith.constant 1 : index
    %24 = vector.load %arg8[%c12, %c1] : memref<36x256xf32, #tpu.memory_space<vmem>>, vector<4x255xf32>
    tpu.vector_store %arg8[%c12, %c1], %23 {strides = array<i32>} : memref<36x256xf32, #tpu.memory_space<vmem>>, vector<4x255xf32>,
    %25 = vector.extract_strided_slice %2 {offsets = [4, 0], sizes = [1, 256], strides = [1, 1]} : vector<9x256xf32> to vector<1x256xf32>
    %26 = vector.broadcast %25 : vector<1x256xf32> to vector<4x256xf32>
    %27 = arith.mulf %1, %26 : vector<4x256xf32>
    %c16_7 = arith.constant 16 : index
    %c0_8 = arith.constant 0 : index
    %28 = vector.load %arg8[%c16_7, %c0_8] : memref<36x256xf32, #tpu.memory_space<vmem>>, vector<4x256xf32>
    tpu.vector_store %arg8[%c16_7, %c0_8], %27 {strides = array<i32>} : memref<36x256xf32, #tpu.memory_space<vmem>>, vector<4x256xf32>,
    %29 = vector.extract_strided_slice %1 {offsets = [0, 1], sizes = [4, 255], strides = [1, 1]} : vector<4x256xf32> to vector<4x255xf32>
    %30 = vector.extract_strided_slice %2 {offsets = [5, 0], sizes = [1, 255], strides = [1, 1]} : vector<9x256xf32> to vector<1x255xf32>
    %31 = vector.broadcast %30 : vector<1x255xf32> to vector<4x255xf32>
    %32 = arith.mulf %29, %31 : vector<4x255xf32>
    %c20 = arith.constant 20 : index
    %c0_9 = arith.constant 0 : index
    %33 = vector.load %arg8[%c20, %c0_9] : memref<36x256xf32, #tpu.memory_space<vmem>>, vector<4x255xf32>
    tpu.vector_store %arg8[%c20, %c0_9], %32 {strides = array<i32>} : memref<36x256xf32, #tpu.memory_space<vmem>>, vector<4x255xf32>,
    %34 = vector.extract_strided_slice %1 {offsets = [0, 15], sizes = [4, 241], strides = [1, 1]} : vector<4x256xf32> to vector<4x241xf32>
    %35 = vector.extract_strided_slice %2 {offsets = [6, 0], sizes = [1, 241], strides = [1, 1]} : vector<9x256xf32> to vector<1x241xf32>
    %36 = vector.broadcast %35 : vector<1x241xf32> to vector<4x241xf32>
    %37 = arith.mulf %34, %36 : vector<4x241xf32>
    %c24 = arith.constant 24 : index
    %c0_10 = arith.constant 0 : index
    %38 = vector.load %arg8[%c24, %c0_10] : memref<36x256xf32, #tpu.memory_space<vmem>>, vector<4x241xf32>
    tpu.vector_store %arg8[%c24, %c0_10], %37 {strides = array<i32>} : memref<36x256xf32, #tpu.memory_space<vmem>>, vector<4x241xf32>,
    %39 = vector.extract_strided_slice %1 {offsets = [0, 16], sizes = [4, 240], strides = [1, 1]} : vector<4x256xf32> to vector<4x240xf32>
    %40 = vector.extract_strided_slice %2 {offsets = [7, 0], sizes = [1, 240], strides = [1, 1]} : vector<9x256xf32> to vector<1x240xf32>
    %41 = vector.broadcast %40 : vector<1x240xf32> to vector<4x240xf32>
    %42 = arith.mulf %39, %41 : vector<4x240xf32>
    %c28 = arith.constant 28 : index
    %c0_11 = arith.constant 0 : index
    %43 = vector.load %arg8[%c28, %c0_11] : memref<36x256xf32, #tpu.memory_space<vmem>>, vector<4x240xf32>
    tpu.vector_store %arg8[%c28, %c0_11], %42 {strides = array<i32>} : memref<36x256xf32, #tpu.memory_space<vmem>>, vector<4x240xf32>,
    %44 = vector.extract_strided_slice %1 {offsets = [0, 17], sizes = [4, 239], strides = [1, 1]} : vector<4x256xf32> to vector<4x239xf32>
    %45 = vector.extract_strided_slice %2 {offsets = [8, 0], sizes = [1, 239], strides = [1, 1]} : vector<9x256xf32> to vector<1x239xf32>
    %46 = vector.broadcast %45 : vector<1x239xf32> to vector<4x239xf32>
    %47 = arith.mulf %44, %46 : vector<4x239xf32>
    %c32 = arith.constant 32 : index
    %c0_12 = arith.constant 0 : index
    %48 = vector.load %arg8[%c32, %c0_12] : memref<36x256xf32, #tpu.memory_space<vmem>>, vector<4x239xf32>
    tpu.vector_store %arg8[%c32, %c0_12], %47 {strides = array<i32>} : memref<36x256xf32, #tpu.memory_space<vmem>>, vector<4x239xf32>,
    %c0_13 = arith.constant 0 : index
    %c0_14 = arith.constant 0 : index
    %49 = vector.load %arg2[%c0_13, %c0_14] : memref<8x36xf32, #tpu.memory_space<vmem>>, vector<8x36xf32>
    %c0_15 = arith.constant 0 : index
    %c0_16 = arith.constant 0 : index
    %50 = vector.load %arg8[%c0_15, %c0_16] : memref<36x256xf32, #tpu.memory_space<vmem>>, vector<36x256xf32>
    %cst_17 = arith.constant dense<0.000000e+00> : vector<8x256xf32>
    %51 = tpu.matmul %49, %50, %cst_17 {dimension_numbers = #tpu.dot_dimension_numbers<[1], [0], [0], [1], [0, 0, 1, 1], [], []>} : vector<8x36xf32>, vector<36x256xf32>, vector<8x256xf32> -> vector<8x256xf32>
    %c0_18 = arith.constant 0 : index
    %c0_19 = arith.constant 0 : index
    %52 = vector.load %arg3[%c0_18, %c0_19] : memref<8x1xf32, #tpu.memory_space<vmem>>, vector<8x1xf32>
    %53 = vector.broadcast %52 : vector<8x1xf32> to vector<8x256xf32>
    %54 = arith.addf %51, %53 : vector<8x256xf32>
    %cst_20 = arith.constant 0.000000e+00 : f32
    %55 = vector.broadcast %cst_20 : f32 to vector<8x256xf32>
    %56 = arith.maximumf %54, %55 : vector<8x256xf32>
    %cst_21 = arith.constant 0.000000e+00 : f32
    %57 = vector.broadcast %cst_21 : f32 to vector<72x256xf32>
    %c0_22 = arith.constant 0 : index
    %c0_23 = arith.constant 0 : index
    %58 = vector.load %arg9[%c0_22, %c0_23] : memref<72x256xf32, #tpu.memory_space<vmem>>, vector<72x256xf32>
    tpu.vector_store %arg9[%c0_22, %c0_23], %57 {strides = array<i32>} : memref<72x256xf32, #tpu.memory_space<vmem>>, vector<72x256xf32>,
    %59 = vector.extract_strided_slice %56 {offsets = [0, 0], sizes = [8, 239], strides = [1, 1]} : vector<8x256xf32> to vector<8x239xf32>
    %60 = vector.extract_strided_slice %2 {offsets = [0, 17], sizes = [1, 239], strides = [1, 1]} : vector<9x256xf32> to vector<1x239xf32>
    %61 = vector.broadcast %60 : vector<1x239xf32> to vector<8x239xf32>
    %62 = arith.mulf %59, %61 : vector<8x239xf32>
    %c0_24 = arith.constant 0 : index
    %c17_25 = arith.constant 17 : index
    %63 = vector.load %arg9[%c0_24, %c17_25] : memref<72x256xf32, #tpu.memory_space<vmem>>, vector<8x239xf32>
    tpu.vector_store %arg9[%c0_24, %c17_25], %62 {strides = array<i32>} : memref<72x256xf32, #tpu.memory_space<vmem>>, vector<8x239xf32>,
    %64 = vector.extract_strided_slice %56 {offsets = [0, 0], sizes = [8, 240], strides = [1, 1]} : vector<8x256xf32> to vector<8x240xf32>
    %65 = vector.extract_strided_slice %2 {offsets = [1, 16], sizes = [1, 240], strides = [1, 1]} : vector<9x256xf32> to vector<1x240xf32>
    %66 = vector.broadcast %65 : vector<1x240xf32> to vector<8x240xf32>
    %67 = arith.mulf %64, %66 : vector<8x240xf32>
    %c8_26 = arith.constant 8 : index
    %c16_27 = arith.constant 16 : index
    %68 = vector.load %arg9[%c8_26, %c16_27] : memref<72x256xf32, #tpu.memory_space<vmem>>, vector<8x240xf32>
    tpu.vector_store %arg9[%c8_26, %c16_27], %67 {strides = array<i32>} : memref<72x256xf32, #tpu.memory_space<vmem>>, vector<8x240xf32>,
    %69 = vector.extract_strided_slice %56 {offsets = [0, 0], sizes = [8, 241], strides = [1, 1]} : vector<8x256xf32> to vector<8x241xf32>
    %70 = vector.extract_strided_slice %2 {offsets = [2, 15], sizes = [1, 241], strides = [1, 1]} : vector<9x256xf32> to vector<1x241xf32>
    %71 = vector.broadcast %70 : vector<1x241xf32> to vector<8x241xf32>
    %72 = arith.mulf %69, %71 : vector<8x241xf32>
    %c16_28 = arith.constant 16 : index
    %c15_29 = arith.constant 15 : index
    %73 = vector.load %arg9[%c16_28, %c15_29] : memref<72x256xf32, #tpu.memory_space<vmem>>, vector<8x241xf32>
    tpu.vector_store %arg9[%c16_28, %c15_29], %72 {strides = array<i32>} : memref<72x256xf32, #tpu.memory_space<vmem>>, vector<8x241xf32>,
    %74 = vector.extract_strided_slice %56 {offsets = [0, 0], sizes = [8, 255], strides = [1, 1]} : vector<8x256xf32> to vector<8x255xf32>
    %75 = vector.extract_strided_slice %2 {offsets = [3, 1], sizes = [1, 255], strides = [1, 1]} : vector<9x256xf32> to vector<1x255xf32>
    %76 = vector.broadcast %75 : vector<1x255xf32> to vector<8x255xf32>
    %77 = arith.mulf %74, %76 : vector<8x255xf32>
    %c24_30 = arith.constant 24 : index
    %c1_31 = arith.constant 1 : index
    %78 = vector.load %arg9[%c24_30, %c1_31] : memref<72x256xf32, #tpu.memory_space<vmem>>, vector<8x255xf32>
    tpu.vector_store %arg9[%c24_30, %c1_31], %77 {strides = array<i32>} : memref<72x256xf32, #tpu.memory_space<vmem>>, vector<8x255xf32>,
    %79 = vector.extract_strided_slice %2 {offsets = [4, 0], sizes = [1, 256], strides = [1, 1]} : vector<9x256xf32> to vector<1x256xf32>
    %80 = vector.broadcast %79 : vector<1x256xf32> to vector<8x256xf32>
    %81 = arith.mulf %56, %80 : vector<8x256xf32>
    %c32_32 = arith.constant 32 : index
    %c0_33 = arith.constant 0 : index
    %82 = vector.load %arg9[%c32_32, %c0_33] : memref<72x256xf32, #tpu.memory_space<vmem>>, vector<8x256xf32>
    tpu.vector_store %arg9[%c32_32, %c0_33], %81 {strides = array<i32>} : memref<72x256xf32, #tpu.memory_space<vmem>>, vector<8x256xf32>,
    %83 = vector.extract_strided_slice %56 {offsets = [0, 1], sizes = [8, 255], strides = [1, 1]} : vector<8x256xf32> to vector<8x255xf32>
    %84 = vector.extract_strided_slice %2 {offsets = [5, 0], sizes = [1, 255], strides = [1, 1]} : vector<9x256xf32> to vector<1x255xf32>
    %85 = vector.broadcast %84 : vector<1x255xf32> to vector<8x255xf32>
    %86 = arith.mulf %83, %85 : vector<8x255xf32>
    %c40 = arith.constant 40 : index
    %c0_34 = arith.constant 0 : index
    %87 = vector.load %arg9[%c40, %c0_34] : memref<72x256xf32, #tpu.memory_space<vmem>>, vector<8x255xf32>
    tpu.vector_store %arg9[%c40, %c0_34], %86 {strides = array<i32>} : memref<72x256xf32, #tpu.memory_space<vmem>>, vector<8x255xf32>,
    %88 = vector.extract_strided_slice %56 {offsets = [0, 15], sizes = [8, 241], strides = [1, 1]} : vector<8x256xf32> to vector<8x241xf32>
    %89 = vector.extract_strided_slice %2 {offsets = [6, 0], sizes = [1, 241], strides = [1, 1]} : vector<9x256xf32> to vector<1x241xf32>
    %90 = vector.broadcast %89 : vector<1x241xf32> to vector<8x241xf32>
    %91 = arith.mulf %88, %90 : vector<8x241xf32>
    %c48 = arith.constant 48 : index
    %c0_35 = arith.constant 0 : index
    %92 = vector.load %arg9[%c48, %c0_35] : memref<72x256xf32, #tpu.memory_space<vmem>>, vector<8x241xf32>
    tpu.vector_store %arg9[%c48, %c0_35], %91 {strides = array<i32>} : memref<72x256xf32, #tpu.memory_space<vmem>>, vector<8x241xf32>,
    %93 = vector.extract_strided_slice %56 {offsets = [0, 16], sizes = [8, 240], strides = [1, 1]} : vector<8x256xf32> to vector<8x240xf32>
    %94 = vector.extract_strided_slice %2 {offsets = [7, 0], sizes = [1, 240], strides = [1, 1]} : vector<9x256xf32> to vector<1x240xf32>
    %95 = vector.broadcast %94 : vector<1x240xf32> to vector<8x240xf32>
    %96 = arith.mulf %93, %95 : vector<8x240xf32>
    %c56 = arith.constant 56 : index
    %c0_36 = arith.constant 0 : index
    %97 = vector.load %arg9[%c56, %c0_36] : memref<72x256xf32, #tpu.memory_space<vmem>>, vector<8x240xf32>
    tpu.vector_store %arg9[%c56, %c0_36], %96 {strides = array<i32>} : memref<72x256xf32, #tpu.memory_space<vmem>>, vector<8x240xf32>,
    %98 = vector.extract_strided_slice %56 {offsets = [0, 17], sizes = [8, 239], strides = [1, 1]} : vector<8x256xf32> to vector<8x239xf32>
    %99 = vector.extract_strided_slice %2 {offsets = [8, 0], sizes = [1, 239], strides = [1, 1]} : vector<9x256xf32> to vector<1x239xf32>
    %100 = vector.broadcast %99 : vector<1x239xf32> to vector<8x239xf32>
    %101 = arith.mulf %98, %100 : vector<8x239xf32>
    %c64 = arith.constant 64 : index
    %c0_37 = arith.constant 0 : index
    %102 = vector.load %arg9[%c64, %c0_37] : memref<72x256xf32, #tpu.memory_space<vmem>>, vector<8x239xf32>
    tpu.vector_store %arg9[%c64, %c0_37], %101 {strides = array<i32>} : memref<72x256xf32, #tpu.memory_space<vmem>>, vector<8x239xf32>,
    %c0_38 = arith.constant 0 : index
    %c0_39 = arith.constant 0 : index
    %103 = vector.load %arg4[%c0_38, %c0_39] : memref<16x72xf32, #tpu.memory_space<vmem>>, vector<16x72xf32>
    %c0_40 = arith.constant 0 : index
    %c0_41 = arith.constant 0 : index
    %104 = vector.load %arg9[%c0_40, %c0_41] : memref<72x256xf32, #tpu.memory_space<vmem>>, vector<72x256xf32>
    %cst_42 = arith.constant dense<0.000000e+00> : vector<16x256xf32>
    %105 = tpu.matmul %103, %104, %cst_42 {dimension_numbers = #tpu.dot_dimension_numbers<[1], [0], [0], [1], [0, 0, 1, 1], [], []>} : vector<16x72xf32>, vector<72x256xf32>, vector<16x256xf32> -> vector<16x256xf32>
    %c0_43 = arith.constant 0 : index
    %c0_44 = arith.constant 0 : index
    %106 = vector.load %arg5[%c0_43, %c0_44] : memref<16x1xf32, #tpu.memory_space<vmem>>, vector<16x1xf32>
    %107 = vector.broadcast %106 : vector<16x1xf32> to vector<16x256xf32>
    %108 = arith.addf %105, %107 : vector<16x256xf32>
    %cst_45 = arith.constant 0.000000e+00 : f32
    %109 = vector.broadcast %cst_45 : f32 to vector<16x256xf32>
    %110 = arith.maximumf %108, %109 : vector<16x256xf32>
    %cst_46 = arith.constant dense<0.000000e+00> : vector<16xf32>
    %111 = vector.multi_reduction <add>, %110, %cst_46 [1] : vector<16x256xf32> to vector<16xf32>
    %112 = vector.shape_cast %111 : vector<16xf32> to vector<16x1xf32>
    %cst_47 = arith.constant 3.906250e-03 : f32
    %113 = vector.broadcast %cst_47 : f32 to vector<16x1xf32>
    %114 = arith.mulf %112, %113 : vector<16x1xf32>
    %115 = vector.shape_cast %114 : vector<16x1xf32> to vector<1x16x1xf32>
    %c0_48 = arith.constant 0 : index
    %c0_49 = arith.constant 0 : index
    %c0_50 = arith.constant 0 : index
    %116 = vector.load %arg7[%c0_48, %c0_49, %c0_50] : memref<1x16x1xf32, #tpu.memory_space<vmem>>, vector<1x16x1xf32>
    tpu.vector_store %arg7[%c0_48, %c0_49, %c0_50], %115 {strides = array<i32>} : memref<1x16x1xf32, #tpu.memory_space<vmem>>, vector<1x16x1xf32>,
    return
  }
  func.func @transform_0(%arg0: i32) -> (i32, i32, i32) {
    %c0_i32 = arith.constant 0 : i32
    %c0_i32_0 = arith.constant 0 : i32
    %c0_i32_1 = arith.constant 0 : i32
    return %arg0, %c0_i32, %c0_i32_0 : i32, i32, i32
  }
  func.func @transform_1(%arg0: i32) -> (i32, i32) {
    %c0_i32 = arith.constant 0 : i32
    %c0_i32_0 = arith.constant 0 : i32
    %c0_i32_1 = arith.constant 0 : i32
    return %c0_i32, %c0_i32_0 : i32, i32
  }
  func.func @transform_2(%arg0: i32) -> (i32, i32) {
    %c0_i32 = arith.constant 0 : i32
    %c0_i32_0 = arith.constant 0 : i32
    %c0_i32_1 = arith.constant 0 : i32
    return %c0_i32, %c0_i32_0 : i32, i32
  }
  func.func @transform_3(%arg0: i32) -> (i32, i32) {
    %c0_i32 = arith.constant 0 : i32
    %c0_i32_0 = arith.constant 0 : i32
    %c0_i32_1 = arith.constant 0 : i32
    return %c0_i32, %c0_i32_0 : i32, i32
  }
  func.func @transform_4(%arg0: i32) -> (i32, i32) {
    %c0_i32 = arith.constant 0 : i32
    %c0_i32_0 = arith.constant 0 : i32
    %c0_i32_1 = arith.constant 0 : i32
    return %c0_i32, %c0_i32_0 : i32, i32
  }
  func.func @transform_5(%arg0: i32) -> (i32, i32) {
    %c0_i32 = arith.constant 0 : i32
    %c0_i32_0 = arith.constant 0 : i32
    %c0_i32_1 = arith.constant 0 : i32
    return %c0_i32, %c0_i32_0 : i32, i32
  }
  func.func @transform_6(%arg0: i32) -> (i32, i32, i32) {
    %c0_i32 = arith.constant 0 : i32
    %c0_i32_0 = arith.constant 0 : i32
    %c0_i32_1 = arith.constant 0 : i32
    return %arg0, %c0_i32, %c0_i32_0 : i32, i32, i32
  }
}

</mosaic_0001>

<bundles_post_ra>
// kernel: feature_extractor_forward.1
= control target key start
LH: loop header
LB: loop body
LE: loop exit
PB: predicated region body
PF: predicated region fallthrough
CT: control target
= control target key end

     0   :  { %s1114_s21 = smov 0   ;;  %s1392_s0 = inlined_call_operand.vmem [shape: f32[2,4,256], index: 0, kind: input, shape index: {}]   ;;  %s1393_s1 = inlined_call_operand.vmem [shape: f32[8,36], index: 1, kind: input, shape index: {}]   ;;  %s1394_s2 = inlined_call_operand.vmem [shape: f32[8,1], index: 2, kind: input, shape index: {}]   ;;  %s1395_s3 = inlined_call_operand.vmem [shape: f32[16,72], index: 3, kind: input, shape index: {}]   ;;  %s1396_s4 = inlined_call_operand.vmem [shape: f32[16,1], index: 4, kind: input, shape index: {}]   ;;  %s1397_s5 = inlined_call_operand.vmem [shape: f32[9,256], index: 5, kind: input, shape index: {}]   ;;  %s1398_s6 = inlined_call_operand.vmem [shape: f32[2,16,1], index: 6, kind: output, shape index: {}]  }
   0x1 LB: > { %s997_s22 = sadd.s32 4294967295, %s1067_s21   ;;  %p1001_p0 = scmp.ge.s32.totalorder %s1067_s21, 1  ;;  %s1067_s21 = sphi %s1114_s21, %s16_s21  }
   0x2   : > { %p212_p1 = scmp.lt.s32.totalorder %s1067_s21, 3 }
   0x4   : > { %p213_p2 = pnand %p1001_p0, %p212_p1 }
   0x5   : > { %v267_v0 = vlaneseq (!%p213_p2)  ;;  %v1127_v2 = vld [vmem:[%s1397_s5] sm:$0xff] (!%p213_p2)  ;;  %v1132_v3 = vld [vmem:[%s1397_s5 + $0x8] sm:$0xff] (!%p213_p2)  ;;  %s1069_s27 = smov (!%p213_p2), 113   ;;  %s1070_s28 = smov (!%p213_p2), 111   ;;  %v1202_v31 = vld [vmem:[%s1397_s5 + $0x10] ss:$0 sm:$0xff] (!%p213_p2) }
   0x6   : > { %216 = sbr.rel (%p213_p2) target bundleno = 1036 (0x40c), region = 44  ;;  %s1071_s29 = smov (!%p213_p2), 127   ;;  %v1207_v32 = vld [vmem:[%s1397_s5 + $0x18] ss:$0 sm:$0xff] (!%p213_p2)  ;;  %v1077_v35 = vmov (!%p213_p2), 0.0   ;;  %vm281_vm0 = vcmask (!%p213_p2), 908288  }
   0x7   : > { %v1122_v1 = vshrl.u32 (!%p213_p2), %v267_v0, 7  ;;  %s1072_s30 = smov (!%p213_p2), 112   ;;  %s1073_s11 = smov (!%p213_p2), 15   ;;  %v506_v34 = vcombine.low (!%p213_p2), %v1202_v31, %v1207_v32  ;;  %257 = vst [vmem:[#allocation2] sm:$0xff] (!%p213_p2), %v1077_v35  ;;  %258 = vst [vmem:[#allocation2 + $0x8] sm:$0xff] (!%p213_p2), %v1077_v35  ;;  %617 = vmatprep.mubr.f32.mxu0 (!%p213_p2), %v1077_v35  ;;  %915 = vmatprep.mubr.f32.mxu1 (!%p213_p2), %v1077_v35  ;;  %vm343_vm1 = vcmask (!%p213_p2), 924672  }
   0x8   : > { %s1074_s12 = smov (!%p213_p2), 1   ;;  %s1075_s13 = smov (!%p213_p2), 16   ;;  %259 = vst [vmem:[#allocation2 + $0x10] sm:$0xff] (!%p213_p2), %v1077_v35  ;;  %260 = vst [vmem:[#allocation2 + $0x18] sm:$0xff] (!%p213_p2), %v1077_v35  ;;  %vm312_vm2 = vcmask (!%p213_p2), 916480   ;;  %vm374_vm3 = vcmask (!%p213_p2), 1039360  }
   0x9   : > { %v331_v4 = vsub.s32 (!%p213_p2), 2, %v1122_v1  ;;  %v269_v5 = vsub.s32 (!%p213_p2), 0, %v1122_v1  ;;  %v362_v6 = vsub.s32 (!%p213_p2), 3, %v1122_v1  ;;  %v300_v7 = vsub.s32 (!%p213_p2), 1, %v1122_v1  ;;  %s1076_s14 = smov (!%p213_p2), 17   ;;  %261 = vst [vmem:[#allocation2 + $0x20] sm:$0xff] (!%p213_p2), %v1077_v35 }
   0xa   : > { %v440_v8 = vsub.s32 (!%p213_p2), 6, %v1122_v1  ;;  %v411_v9 = vsub.s32 (!%p213_p2), 5, %v1122_v1  ;;  %v469_v26 = vsub.s32 (!%p213_p2), 7, %v1122_v1  ;;  %262 = vst [vmem:[#allocation2 + $0x28] sm:$0xff] (!%p213_p2), %v1077_v35  ;;  %263 = vst [vmem:[#allocation2 + $0x30] sm:$0xff] (!%p213_p2), %v1077_v35  ;;  %p242_p3 = scmp.lt.s32.totalorder (!%p213_p2), %s997_s22, 1 }
   0xb   : > { %v1141_v10 = vrot.slane (!%p213_p2), %v1127_v2, %v331_v4  ;;  %v1144_v11 = vrot.slane (!%p213_p2), %v1132_v3, %v331_v4  ;;  %v1147_v12 = vrot.slane (!%p213_p2), %v1127_v2, %v269_v5  ;;  %v1150_v13 = vrot.slane (!%p213_p2), %v1132_v3, %v269_v5  ;;  %264 = vst [vmem:[#allocation2 + $0x38] sm:$0xff] (!%p213_p2), %v1077_v35 }
   0xc   : > { %v1153_v14 = vrot.slane (!%p213_p2), %v1127_v2, %v362_v6  ;;  %v1156_v15 = vrot.slane (!%p213_p2), %v1132_v3, %v362_v6  ;;  %v1159_v16 = vrot.slane (!%p213_p2), %v1127_v2, %v300_v7  ;;  %v1162_v17 = vrot.slane (!%p213_p2), %v1132_v3, %v300_v7  ;;  %265 = vst [vmem:[#allocation2 + $0x40] sm:$0xf] (!%p213_p2), %v1077_v35 }
   0xd   : > { %v339_v18 = vcombine.low %v1141_v10, %v1144_v11  ;;  %v277_v19 = vcombine.low %v1147_v12, %v1150_v13  ;;  %v1171_v21 = vrot.slane %v1127_v2, %v440_v8  ;;  %v1174_v22 = vrot.slane %v1132_v3, %v440_v8  ;;  %266 = vst [vmem:[#allocation2 + $0x48] sm:$0xf] %v1077_v35  ;;  %s1400_s22 = smov (!%p242_p3, %s997_s22), 1 }
   0xe   : > { %v370_v20 = vcombine.low %v1153_v14, %v1156_v15  ;;  %v308_v23 = vcombine.low %v1159_v16, %v1162_v17  ;;  %v1181_v24 = vrot.slane %v1127_v2, %v411_v9  ;;  %v1184_v25 = vrot.slane %v1132_v3, %v411_v9  ;;  %626 = vst [vmem:[#allocation3] sm:$0xff] %v1077_v35  ;;  %s1015_s15 = sshll.u32 %s1400_s22, 3  ;;  %s1016_s9 = sshll.u32 %s1400_s22, 4 }
   0xf   : > { %340 = vrot.lane.b32.xlu1 %v339_v18, %s1069_s27  ;;  %278 = vrot.lane.b32.xlu0 %v277_v19, %s1070_s28  ;;  %v448_v27 = vcombine.low %v1171_v21, %v1174_v22  ;;  %v1194_v29 = vrot.slane %v1127_v2, %v469_v26  ;;  %v1197_v30 = vrot.slane %v1132_v3, %v469_v26  ;;  %v393_v36 = vsub.s32 4, %v1122_v1  ;;  %s246_s18 = scalar_lea.vmem %s1392_s0, %s1015_s15 }
  0x10   : > { %v419_v28 = vcombine.low %v1181_v24, %v1184_v25  ;;  %628 = vst [vmem:[#allocation3 + $0x10] sm:$0xff] %v1077_v35  ;;  %630 = vst [vmem:[#allocation3 + $0x20] sm:$0xff] %v1077_v35  ;;  %v252_v41 = vld [vmem:[%s246_s18] sm:$0xff]  ;;  %vm353_vm4 = vcmask 121856   ;;  %vm384_vm5 = vcmask 7168   ;;  %vm322_vm6 = vcmask 130048  }
  0x11   : > { %v477_v33 = vcombine.low %v1194_v29, %v1197_v30  ;;  %632 = vst [vmem:[#allocation3 + $0x30] sm:$0xff] %v1077_v35  ;;  %637 = vst [vmem:[#allocation3 + $0x58] sm:$0xff] %v1077_v35  ;;  %v1249_v37 = vrot.slane %v1127_v2, %v393_v36  ;;  %v1252_v38 = vrot.slane %v1132_v3, %v393_v36  ;;  %vm291_vm7 = vcmask 138240   ;;  %v536_v36 = vld [vmem:[%s1394_s2] sm:$0xff] }
  0x12   : > { %639 = vst [vmem:[#allocation3 + $0x68] sm:$0xff] %v1077_v35  ;;  %641 = vst [vmem:[#allocation3 + $0x78] sm:$0xff] %v1077_v35  ;;  %vm295_vm8 = vcmask 1043592   ;;  %vm357_vm9 = vcmask 1043576   ;;  %vm436_vm10 = vcmask 1039364   ;;  %vm326_vm11 = vcmask 1047684  }
  0x13   : > { %371 = vrot.lane.b32.xlu1 %v370_v20, %s1071_s29  ;;  %309 = vrot.lane.b32.xlu0 %v308_v23, %s1072_s30  ;;  %643 = vst [vmem:[#allocation3 + $0x88] sm:$0xff] %v1077_v35  ;;  %v401_v39 = vcombine.low %v1249_v37, %v1252_v38  ;;  %vm388_vm12 = vcmask 1047564   ;;  %vm465_vm13 = vcmask 920576   ;;  %vm494_vm14 = vcmask 916484  }
  0x14   : > { %vm523_vm15 = vcmask 904192  }
  0x15   : > { %v403_v45 = vmul.f32 %v401_v39, %v252_v41  ;;  %v1078_v39 = vmov 0  }
  0x16   : > { %1059 = vset.pattern.permute.xlu0 %v1078_v39  ;;  %1060 = vset.pattern.permute.xlu1 %v1078_v39 }
  0x17   : > { %449 = vrot.lane.b32.xlu1 %v448_v27, %s1073_s11  ;;  %420 = vrot.lane.b32.xlu0 %v419_v28, %s1074_s12  ;;  %v405_v47 = vcombine.high %v403_v45, %v403_v45  ;;  %407 = vst [vmem:[#allocation2 + $0x20] sm:$0xf] %v403_v45 }
  0x19   : > { %408 = vst [vmem:[#allocation2 + $0x28] sm:$0xf] %v405_v47 }
  0x1b   : > { %478 = vrot.lane.b32.xlu0 %v477_v33, %s1075_s13  ;;  %507 = vrot.lane.b32.xlu1 %v506_v34, %s1076_s14 }
  0x81   : > { %v341_v40 = vpop.permute.xlu1 %340  ;;  %v279_v42 = vpop.permute.xlu0 %278 }
  0x82   : > { %v342_v43 = vrot.slane %v341_v40, 4  ;;  %v280_v44 = vrot.slane %v279_v42, 4 }
  0x84   : > { %v282_v46 = vsel %vm281_vm0, %v279_v42, %v280_v44  ;;  %v344_v51 = vsel %vm343_vm1, %v341_v40, %v342_v43 }
  0x85   : > { %v284_v48 = vmul.f32 %v282_v46, %v252_v41  ;;  %v372_v49 = vpop.permute.xlu1 %371  ;;  %v310_v50 = vpop.permute.xlu0 %309  ;;  %v346_v55 = vmul.f32 %v344_v51, %v252_v41 }
  0x86   : > { %v373_v52 = vrot.slane %v372_v49, 4  ;;  %v311_v53 = vrot.slane %v310_v50, 4 }
  0x87   : > { %287 = vrot.lane.b32.xlu0 %v284_v48, %s1076_s14  ;;  %v286_v8 = vcombine.high %v284_v48, %v284_v48  ;;  %v348_v23 = vcombine.high %v346_v55, %v346_v55 }
  0x88   : > { %v313_v54 = vsel %vm312_vm2, %v310_v50, %v311_v53  ;;  %v375_v59 = vsel %vm374_vm3, %v372_v49, %v373_v52 }
  0x89   : > { %v315_v56 = vmul.f32 %v313_v54, %v252_v41  ;;  %v450_v57 = vpop.permute.xlu1 %449  ;;  %v421_v58 = vpop.permute.xlu0 %420  ;;  %v377_v63 = vmul.f32 %v375_v59, %v252_v41 }
  0x8a   : > { %v451_v60 = vrot.slane %v450_v57, 4  ;;  %v422_v61 = vrot.slane %v421_v58, 4 }
  0x8b   : > { %320 = vrot.lane.b32.xlu1 %v315_v56, %s1075_s13  ;;  %349 = vrot.lane.b32.xlu0 %v346_v55, %s1073_s11  ;;  %v317_v5 = vcombine.low %v315_v56, %v315_v56  ;;  %v379_v7 = vcombine.low %v377_v63, %v377_v63 }
  0x8c   : > { %v452_v62 = vsel %vm353_vm4, %v451_v60, %v450_v57  ;;  %v423_v2 = vsel %vm384_vm5, %v422_v61, %v421_v58  ;;  %v525_v61 = vld [vmem:[%s1393_s1] sm:$0xff] }
  0x8d   : > { %v454_v0 = vmul.f32 %v452_v62, %v252_v41  ;;  %v479_v1 = vpop.permute.xlu0 %478  ;;  %v425_v4 = vmul.f32 %v423_v2, %v252_v41  ;;  %v508_v9 = vpop.permute.xlu1 %507 }
  0x8e   : > { %v480_v3 = vrot.slane %v479_v1, 4  ;;  %v509_v19 = vrot.slane %v508_v9, 4 }
  0x8f   : > { %382 = vrot.lane.b32.xlu1 %v377_v63, %s1074_s12  ;;  %457 = vrot.lane.b32.xlu0 %v454_v0, %s1069_s27  ;;  %v427_v20 = vcombine.low %v425_v4, %v425_v4  ;;  %v456_v28 = vcombine.high %v454_v0, %v454_v0 }
  0x90   : > { %v481_v6 = vsel %vm322_vm6, %v480_v3, %v479_v1  ;;  %v510_v27 = vsel %vm291_vm7, %v509_v19, %v508_v9 }
  0x91   : > { %v483_v18 = vmul.f32 %v481_v6, %v252_v41  ;;  %v512_v33 = vmul.f32 %v510_v27, %v252_v41 }
  0x93   : > { %430 = vrot.lane.b32.xlu1 %v425_v4, %s1071_s29  ;;  %318 = vrot.lane.b32.xlu0 %v317_v5, %s1075_s13  ;;  %v485_v26 = vcombine.low %v483_v18, %v483_v18  ;;  %v514_v34 = vcombine.high %v512_v33, %v512_v33 }
  0x97   : > { %380 = vrot.lane.b32.xlu0 %v379_v7, %s1074_s12  ;;  %289 = vrot.lane.b32.xlu1 %v286_v8, %s1076_s14 }
  0x9b   : > { %428 = vrot.lane.b32.xlu0 %v427_v20, %s1071_s29  ;;  %351 = vrot.lane.b32.xlu1 %v348_v23, %s1073_s11 }
  0x9f   : > { %459 = vrot.lane.b32.xlu1 %v456_v28, %s1069_s27  ;;  %486 = vrot.lane.b32.xlu0 %v485_v26, %s1072_s30 }
  0xa3   : > { %488 = vrot.lane.b32.xlu1 %v483_v18, %s1072_s30  ;;  %515 = vrot.lane.b32.xlu0 %v512_v33, %s1070_s28 }
  0xa7   : > { %517 = vrot.lane.b32.xlu1 %v514_v34, %s1070_s28  ;;  %539 = vperm.xlu0 %1059, %v536_v36  }
  0xab   : > { %644 = vrot.lane.b32.xlu1 %v1147_v12, %s1070_s28  ;;  %665 = vrot.lane.b32.xlu0 %v1159_v16, %s1072_s30 }
  0xaf   : > { %646 = vrot.lane.b32.xlu1 %v1150_v13, %s1070_s28  ;;  %686 = vrot.lane.b32.xlu0 %v1141_v10, %s1069_s27 }
  0xb3   : > { %667 = vrot.lane.b32.xlu1 %v1162_v17, %s1072_s30  ;;  %707 = vrot.lane.b32.xlu0 %v1153_v14, %s1071_s29 }
  0xb7   : > { %688 = vrot.lane.b32.xlu1 %v1144_v11, %s1069_s27  ;;  %732 = vrot.lane.b32.xlu0 %v1181_v24, %s1074_s12 }
  0xbb   : > { %709 = vrot.lane.b32.xlu1 %v1156_v15, %s1071_s29  ;;  %752 = vrot.lane.b32.xlu0 %v1171_v21, %s1073_s11 }
  0xbf   : > { %734 = vrot.lane.b32.xlu1 %v1184_v25, %s1074_s12  ;;  %772 = vrot.lane.b32.xlu0 %v1194_v29, %s1075_s13 }
  0xc3   : > { %754 = vrot.lane.b32.xlu1 %v1174_v22, %s1073_s11  ;;  %792 = vrot.lane.b32.xlu0 %v1202_v31, %s1076_s14 }
  0xc7   : > { %774 = vrot.lane.b32.xlu1 %v1197_v30, %s1075_s13 }
  0xcb   : > { %794 = vrot.lane.b32.xlu1 %v1207_v32, %s1076_s14 }
  0xf9   : > { %v288_v10 = vpop.permute.xlu0 %287 }
  0xfa   : > { %296 = vst.msk [vmem:[#allocation2] sm:$0xf] %vm295_vm8, %v288_v10  ;;  %vm546_vm8 = vcmask 1043456  }
  0xfd   : > { %v321_v11 = vpop.permute.xlu1 %320  ;;  %v350_v12 = vpop.permute.xlu0 %349 }
  0xfe   : > { %358 = vst.msk [vmem:[#allocation2 + $0x10] sm:$0xf] %vm357_vm9, %v350_v12  ;;  %vm542_vm9 = vcmask 293888  }
 0x101   : > { %v383_v13 = vpop.permute.xlu1 %382  ;;  %v458_v14 = vpop.permute.xlu0 %457 }
 0x105   : > { %v431_v15 = vpop.permute.xlu1 %430  ;;  %v319_v16 = vpop.permute.xlu0 %318 }
 0x106   : > { %437 = vst.msk [vmem:[#allocation2 + $0x28] sm:$0xf0] %vm436_vm10, %v431_v15  ;;  %v323_v17 = vsel %vm322_vm6, %v319_v16, %v321_v11  ;;  %vm662_vm10 = vcmask 1047688  }
 0x107   : > { %327 = vst.msk [vmem:[#allocation2] sm:$0xf0] %vm326_vm11, %v319_v16  ;;  %328 = vst [vmem:[#allocation2 + $0x8] sm:$0xf0] %v323_v17  ;;  %vm683_vm11 = vcmask 1047680  }
 0x109   : > { %v381_v21 = vpop.permute.xlu0 %380  ;;  %v290_v22 = vpop.permute.xlu1 %289 }
 0x10a   : > { %v385_v24 = vsel %vm384_vm5, %v381_v21, %v383_v13  ;;  %389 = vst.msk [vmem:[#allocation2 + $0x10] sm:$0xf0] %vm388_vm12, %v381_v21  ;;  %v292_v25 = vsel %vm291_vm7, %v288_v10, %v290_v22  ;;  %vm704_vm12 = vcmask 1047672  }
 0x10b   : > { %390 = vst [vmem:[#allocation2 + $0x18] sm:$0xf0] %v385_v24  ;;  %297 = vst [vmem:[#allocation2 + $0x8] sm:$0xf] %v292_v25 }
 0x10d   : > { %v429_v29 = vpop.permute.xlu0 %428  ;;  %v352_v30 = vpop.permute.xlu1 %351  ;;  %v531_v54 = vld [vmem:[#allocation2 + $0x28] sm:$0xff] }
 0x10e   : > { %v432_v31 = vsel %vm374_vm3, %v429_v29, %v431_v15  ;;  %v354_v32 = vsel %vm353_vm4, %v350_v12, %v352_v30  ;;  %v526_v49 = vld [vmem:[#allocation2] sm:$0xff] }
 0x10f   : > { %435 = vst [vmem:[#allocation2 + $0x20] sm:$0xf0] %v432_v31  ;;  %359 = vst [vmem:[#allocation2 + $0x18] sm:$0xf] %v354_v32 }
 0x111   : > { %v460_v40 = vpop.permute.xlu1 %459  ;;  %v487_v42 = vpop.permute.xlu0 %486  ;;  %v528_v44 = vld [vmem:[#allocation2 + $0x10] sm:$0xff] }
 0x112   : > { %v461_v41 = vsel %vm343_vm1, %v458_v14, %v460_v40  ;;  %466 = vst.msk [vmem:[#allocation2 + $0x38] sm:$0xf] %vm465_vm13, %v460_v40  ;;  %v527_v46 = vld [vmem:[#allocation2 + $0x8] sm:$0xff]  ;;  %v1019_v50 = vpack.c.bf16 %v528_v44, %v526_v49  ;;  %v832_v49 = vld [vmem:[%s1396_s4] sm:$0xff]  ;;  %vm725_vm13 = vcmask 1047560  }
 0x113   : > { %464 = vst [vmem:[#allocation2 + $0x30] sm:$0xf] %v461_v41 }
 0x115   : > { %v489_v43 = vpop.permute.xlu1 %488  ;;  %v516_v51 = vpop.permute.xlu0 %515 }
 0x116   : > { %v490_v45 = vsel %vm312_vm2, %v487_v42, %v489_v43  ;;  %495 = vst.msk [vmem:[#allocation2 + $0x38] sm:$0xf0] %vm494_vm14, %v489_v43  ;;  %v529_v47 = vld [vmem:[#allocation2 + $0x18] sm:$0xff]  ;;  %v530_v57 = vld [vmem:[#allocation2 + $0x20] sm:$0xff] }
 0x117   : > { %493 = vst [vmem:[#allocation2 + $0x30] sm:$0xf0] %v490_v45  ;;  %v1017_v48 = vpack.c.bf16 %v529_v47, %v527_v46 }
 0x119   : > { %1018 = vmatprep.subr.bf16.mxu0 %v1017_v48  ;;  %v518_v52 = vpop.permute.xlu1 %517 }
 0x11a   : > { %v519_v53 = vsel %vm281_vm0, %v516_v51, %v518_v52  ;;  %524 = vst.msk [vmem:[#allocation2 + $0x48] sm:$0xf] %vm523_vm15, %v518_v52  ;;  %1020 = vmatpush1.bf16.msra.mxu0 %v1019_v50  ;;  %v833_v50 = vld [vmem:[%s1396_s4 + $0x8] sm:$0xff] }
 0x11b   : > { %522 = vst [vmem:[#allocation2 + $0x40] sm:$0xf] %v519_v53 }
 0x11d   : > { %v533_v55 = vld [vmem:[#allocation2 + $0x38] sm:$0xff]  ;;  %v645_v63 = vpop.permute.xlu1 %644 }
 0x11e   : > { %v1021_v56 = vpack.c.bf16 %v533_v55, %v531_v54  ;;  %v532_v58 = vld [vmem:[#allocation2 + $0x30] sm:$0xff] }
 0x11f   : > { %v1023_v59 = vpack.c.bf16 %v532_v58, %v530_v57 }
 0x120   : > { %1022 = vmatprep.subr.bf16.mxu0 %v1021_v56 }
 0x121   : > { %1024 = vmatpush1.bf16.msra.mxu0 %v1023_v59  ;;  %v535_v60 = vld [vmem:[#allocation2 + $0x48] sm:$0xf]  ;;  %v647_v1 = vpop.permute.xlu1 %646 }
 0x122   : > { %1008 = vmatprep.subr.msk.mxu0 %vm546_vm8, %v535_v60  ;;  %v534_v62 = vld [vmem:[#allocation2 + $0x40] sm:$0xf]  ;;  %v648_v19 = vsel %vm281_vm0, %v645_v63, %v647_v1 }
 0x125   : > { %1009 = vmatpush1.msk.msra.mxu0 %vm546_vm8, %v534_v62  ;;  %v668_v3 = vpop.permute.xlu1 %667 }
 0x126   : > { %1010 = vmatmul.mubr.msk.f32.vlgmr.msra.gmra.mrb[0].mxu0 %vm542_vm9, %v525_v61  ;;  %v540_v0 = vpop.permute.xlu0 %539 }
 0x129   : > { %v689_v5 = vpop.permute.xlu1 %688 }
 0x12a   : > { %v666_v2 = vpop.permute.xlu0 %665 }
 0x12b   : > { %v669_v28 = vsel %vm312_vm2, %v666_v2, %v668_v3 }
 0x12d   : > { %v710_v23 = vpop.permute.xlu1 %709 }
 0x12e   : > { %v687_v4 = vpop.permute.xlu0 %686 }
 0x12f   : > { %v690_v10 = vsel %vm343_vm1, %v687_v4, %v689_v5 }
 0x131   : > { %v735_v12 = vpop.permute.xlu1 %734 }
 0x132   : > { %v708_v20 = vpop.permute.xlu0 %707 }
 0x133   : > { %v711_v15 = vsel %vm374_vm3, %v708_v20, %v710_v23 }
 0x135   : > { %v755_v17 = vpop.permute.xlu1 %754 }
 0x136   : > { %v733_v11 = vpop.permute.xlu0 %732 }
 0x137   : > { %v736_v22 = vsel %vm384_vm5, %v733_v11, %v735_v12 }
 0x139   : > { %v775_v29 = vpop.permute.xlu1 %774 }
 0x13d   : > { %v795_v43 = vpop.permute.xlu1 %794 }
 0x1f9   : > { %v619_v6 = vpop.f32.mrb[0].mxu0 }
 0x1fa   : > { %v620_v7 = vadd.f32 %v619_v6, %v540_v0  ;;  %v621_v8 = vpop.f32.mrb[1].mxu0 }
 0x1fb   : > { %v622_v9 = vadd.f32 %v621_v8, %v540_v0 }
 0x1fc   : > { %v624_v18 = vmax.f32 %v620_v7, 0.0 }
 0x1fd   : > { %v625_v26 = vmax.f32 %v622_v9, 0.0 }
 0x1fe   : > { %v651_v27 = vmul.f32 %v648_v19, %v624_v18  ;;  %v672_v34 = vmul.f32 %v669_v28, %v624_v18  ;;  %v1334_v39 = vmul.f32 %v624_v18, %v1249_v37  ;;  %v693_v14 = vmul.f32 %v690_v10, %v624_v18 }
 0x1ff   : > { %v652_v33 = vmul.f32 %v647_v1, %v625_v26  ;;  %v1331_v36 = vmul.f32 %v625_v26, %v1252_v38  ;;  %v673_v13 = vmul.f32 %v668_v3, %v625_v26  ;;  %v694_v16 = vmul.f32 %v689_v5, %v625_v26  ;;  %v753_v38 = vpop.permute.xlu0 %752 }
 0x200   : > { %655 = vrot.lane.b32.xlu0 %v651_v27, %s1076_s14  ;;  %v714_v37 = vmul.f32 %v711_v15, %v624_v18  ;;  %v715_v21 = vmul.f32 %v710_v23, %v625_v26  ;;  %v739_v24 = vmul.f32 %v733_v11, %v624_v18  ;;  %v740_v30 = vmul.f32 %v736_v22, %v625_v26 }
 0x201   : > { %657 = vrot.lane.b32.xlu1 %v652_v33, %s1076_s14  ;;  %v756_v31 = vsel %vm353_vm4, %v753_v38, %v755_v17  ;;  %v759_v32 = vmul.f32 %v753_v38, %v624_v18 }
 0x202   : > { %v760_v40 = vmul.f32 %v756_v31, %v625_v26 }
 0x203   : > { %v773_v25 = vpop.permute.xlu0 %772 }
 0x204   : > { %676 = vrot.lane.b32.xlu0 %v672_v34, %s1075_s13  ;;  %v776_v41 = vsel %vm322_vm6, %v773_v25, %v775_v29  ;;  %v779_v44 = vmul.f32 %v773_v25, %v624_v18 }
 0x205   : > { %678 = vrot.lane.b32.xlu1 %v673_v13, %s1075_s13  ;;  %v780_v45 = vmul.f32 %v776_v41, %v625_v26 }
 0x207   : > { %v793_v42 = vpop.permute.xlu0 %792 }
 0x208   : > { %697 = vrot.lane.b32.xlu0 %v693_v14, %s1073_s11  ;;  %v796_v46 = vsel %vm291_vm7, %v793_v42, %v795_v43  ;;  %v799_v47 = vmul.f32 %v793_v42, %v624_v18 }
 0x209   : > { %699 = vrot.lane.b32.xlu1 %v694_v16, %s1073_s11  ;;  %v800_v48 = vmul.f32 %v796_v46, %v625_v26 }
 0x20c   : > { %718 = vrot.lane.b32.xlu0 %v714_v37, %s1074_s12 }
 0x20d   : > { %720 = vrot.lane.b32.xlu1 %v715_v21, %s1074_s12  ;;  %s251_s12 = scalar_lea.vmem %s1398_s6, %s1016_s9 }
 0x210   : > { %743 = vrot.lane.b32.xlu0 %v739_v24, %s1071_s29 }
 0x211   : > { %745 = vrot.lane.b32.xlu1 %v740_v30, %s1071_s29 }
 0x214   : > { %763 = vrot.lane.b32.xlu0 %v759_v32, %s1069_s27 }
 0x215   : > { %765 = vrot.lane.b32.xlu1 %v760_v40, %s1069_s27 }
 0x218   : > { %783 = vrot.lane.b32.xlu0 %v779_v44, %s1072_s30 }
 0x219   : > { %785 = vrot.lane.b32.xlu1 %v780_v45, %s1072_s30 }
 0x21c   : > { %803 = vrot.lane.b32.xlu0 %v799_v47, %s1070_s28 }
 0x21d   : > { %805 = vrot.lane.b32.xlu1 %v800_v48, %s1070_s28 }
 0x220   : > { %836 = vperm.xlu0 %1059, %v832_v49  }
 0x221   : > { %841 = vperm.xlu1 %1060, %v833_v50  }
 0x272   : > { %v656_v51 = vpop.permute.xlu0 %655 }
 0x273   : > { %663 = vst.msk [vmem:[#allocation3] sm:$0xff] %vm662_vm10, %v656_v51  ;;  %v658_v52 = vpop.permute.xlu1 %657 }
 0x274   : > { %v659_v53 = vsel %vm291_vm7, %v656_v51, %v658_v52 }
 0x276   : > { %v677_v54 = vpop.permute.xlu0 %676 }
 0x277   : > { %684 = vst.msk [vmem:[#allocation3 + $0x10] sm:$0xff] %vm683_vm11, %v677_v54  ;;  %v679_v55 = vpop.permute.xlu1 %678 }
 0x278   : > { %v680_v56 = vsel %vm322_vm6, %v677_v54, %v679_v55 }
 0x279   : > { %v1025_v57 = vpack.c.bf16 %v680_v56, %v659_v53 }
 0x27a   : > { %v698_v58 = vpop.permute.xlu0 %697  ;;  %v814_v62 = vld [vmem:[#allocation3] sm:$0xff] }
 0x27b   : > { %705 = vst.msk [vmem:[#allocation3 + $0x20] sm:$0xff] %vm704_vm12, %v698_v58  ;;  %v700_v59 = vpop.permute.xlu1 %699  ;;  %1026 = vmatprep.subr.bf16.mxu1 %v1025_v57 }
 0x27c   : > { %v701_v60 = vsel %vm353_vm4, %v698_v58, %v700_v59 }
 0x27e   : > { %v719_v61 = vpop.permute.xlu0 %718  ;;  %v816_v63 = vld [vmem:[#allocation3 + $0x10] sm:$0xff] }
 0x27f   : > { %726 = vst.msk [vmem:[#allocation3 + $0x30] sm:$0xff] %vm725_vm13, %v719_v61  ;;  %v721_v0 = vpop.permute.xlu1 %720  ;;  %v1027_v1 = vpack.c.bf16 %v816_v63, %v814_v62 }
 0x280   : > { %v722_v2 = vsel %vm384_vm5, %v719_v61, %v721_v0 }
 0x281   : > { %1028 = vmatpush1.bf16.msra.mxu1 %v1027_v1  ;;  %v1029_v3 = vpack.c.bf16 %v722_v2, %v701_v60 }
 0x282   : > { %v744_v4 = vpop.permute.xlu0 %743  ;;  %v818_v8 = vld [vmem:[#allocation3 + $0x20] sm:$0xff] }
 0x283   : > { %v746_v5 = vpop.permute.xlu1 %745  ;;  %1030 = vmatprep.subr.bf16.mxu1 %v1029_v3 }
 0x284   : > { %v747_v6 = vsel %vm374_vm3, %v744_v4, %v746_v5  ;;  %751 = vst.msk [vmem:[#allocation3 + $0x58] sm:$0xff] %vm374_vm3, %v746_v5 }
 0x285   : > { %v1035_v34 = vpack.c.bf16 %v747_v6, %v1334_v39  ;;  %v813_v39 = vld [vmem:[%s1395_s3 + $0x8] sm:$0xff] }
 0x286   : > { %v764_v7 = vpop.permute.xlu0 %763  ;;  %v820_v9 = vld [vmem:[#allocation3 + $0x30] sm:$0xff] }
 0x287   : > { %v766_v18 = vpop.permute.xlu1 %765  ;;  %v1031_v19 = vpack.c.bf16 %v820_v9, %v818_v8 }
 0x288   : > { %v767_v20 = vsel %vm343_vm1, %v764_v7, %v766_v18  ;;  %771 = vst.msk [vmem:[#allocation3 + $0x68] sm:$0xff] %vm343_vm1, %v766_v18  ;;  %vm844_vm1 = vcmask 588800  }
 0x289   : > { %1032 = vmatpush1.bf16.msra.mxu1 %v1031_v19 }
 0x28a   : > { %v784_v23 = vpop.permute.xlu0 %783 }
 0x28b   : > { %v786_v26 = vpop.permute.xlu1 %785  ;;  %v825_v27 = vld [vmem:[#allocation3 + $0x58] sm:$0xff] }
 0x28c   : > { %v787_v28 = vsel %vm312_vm2, %v784_v23, %v786_v26  ;;  %791 = vst.msk [vmem:[#allocation3 + $0x78] sm:$0xff] %vm312_vm2, %v786_v26  ;;  %v1033_v33 = vpack.c.bf16 %v825_v27, %v1331_v36  ;;  %v812_v36 = vld [vmem:[%s1395_s3] sm:$0xff] }
 0x28d   : > { %v1039_v16 = vpack.c.bf16 %v787_v28, %v767_v20 }
 0x28e   : > { %v804_v10 = vpop.permute.xlu0 %803  ;;  %1034 = vmatprep.subr.bf16.mxu1 %v1033_v33 }
 0x28f   : > { %v806_v11 = vpop.permute.xlu1 %805  ;;  %1036 = vmatpush1.bf16.msra.mxu1 %v1035_v34  ;;  %v827_v13 = vld [vmem:[#allocation3 + $0x68] sm:$0xff] }
 0x290   : > { %v807_v12 = vsel %vm281_vm0, %v804_v10, %v806_v11  ;;  %811 = vst.msk [vmem:[#allocation3 + $0x88] sm:$0xff] %vm281_vm0, %v806_v11 }
 0x293   : > { %v829_v14 = vld [vmem:[#allocation3 + $0x78] sm:$0xff] }
 0x294   : > { %v1037_v15 = vpack.c.bf16 %v829_v14, %v827_v13 }
 0x296   : > { %1038 = vmatprep.subr.bf16.mxu1 %v1037_v15 }
 0x297   : > { %1040 = vmatpush1.bf16.msra.mxu1 %v1039_v16  ;;  %v831_v38 = vld [vmem:[#allocation3 + $0x88] sm:$0xff] }
 0x298   : > { %867 = vmatprep.subr.mxu1 %v831_v38 }
 0x29b   : > { %868 = vmatpush1.msra.mxu1 %v807_v12 }
 0x29c   : > { %1011 = vmatmul.mubr.msk.f32.vlgmr.msra.gmra.mrb[0].mxu1 %vm844_vm1, %v812_v36 }
 0x29d   : > { %921 = vmatprep.mubr.f32.mxu1 %v1077_v35 }
 0x29f   : > { %v837_v17 = vpop.permute.xlu0 %836 }
 0x2a0   : > { %1012 = vmatmul.mubr.msk.f32.gmra.mrb[2].mxu1 %vm844_vm1, %v813_v39  ;;  %v842_v25 = vpop.permute.xlu1 %841 }
 0x36f   : > { %v917_v37 = vpop.f32.mrb[0].mxu1 }
 0x370   : > { %v918_v21 = vadd.f32 %v917_v37, %v837_v17  ;;  %v919_v22 = vpop.f32.mrb[1].mxu1 }
 0x371   : > { %v920_v24 = vadd.f32 %v919_v22, %v837_v17 }
 0x372   : > { %v928_v29 = vmax.f32 %v918_v21, 0.0 }
 0x373   : > { %v929_v30 = vmax.f32 %v920_v24, 0.0  ;;  %v923_v31 = vpop.f32.mrb[2].mxu1 }
 0x374   : > { %v924_v32 = vadd.f32 %v923_v31, %v842_v25  ;;  %v925_v40 = vpop.f32.mrb[3].mxu1 }
 0x375   : > { %v926_v41 = vadd.f32 %v925_v40, %v842_v25  ;;  %v932_v42 = vadd.f32 %v929_v30, %v928_v29 }
 0x376   : > { %v930_v35 = vmax.f32 %v924_v32, 0.0 }
 0x377   : > { %v931_v43 = vmax.f32 %v926_v41, 0.0  ;;  %933 = vadd.xlane.f32.xlu0 %v932_v42 }
 0x379   : > { %v935_v44 = vadd.f32 %v931_v43, %v930_v35 }
 0x37b   : > { %936 = vadd.xlane.f32.xlu1 %v935_v44 }
 0x404   : > { %v934_v45 = vpop.xlane.xlu0 %933 }
 0x405   : > { %v938_v46 = vmul.f32 0.00390625, %v934_v45 }
 0x407   : > { %940 = vst.msk [vmem:[%s251_s12] sm:$0xff] %vm384_vm5, %v938_v46 }
 0x408   : > { %v937_v47 = vpop.xlane.xlu1 %936 }
 0x409   : > { %v939_v48 = vmul.f32 0.00390625, %v937_v47 }
 0x40b   : > { %941 = vst.msk [vmem:[%s251_s12 + $0x8] sm:$0xff] %vm384_vm5, %v939_v48 }
 0x40c PF: > { %s16_s21 = sadd.s32 1, %s1067_s21  }
 0x40d   : > { %p13_p4 = scmp.ge.s32.totalorder %s16_s21, 4  }
 0x40f   :  { %15 = sbr.rel (!%p13_p4) target bundleno = 1 (0x1), region = 74 }

</bundles_post_ra>
